<compile_context>
chip_gen: v5e
topology: v5e:2x2
jax: 0.10.0
libtpu: 0.0.40
codegen_flags: <defaults>
</compile_context>

<pallas_src>
import functools

import jax
import jax.numpy as jnp
from jax import lax
from jax.experimental import pallas as pl
from jax.experimental.pallas import tpu as pltpu


def _cdiv(a, b):
    return -(-a // b)


def _round_up(x, m):
    return _cdiv(x, m) * m


def _vmem_capacity_bytes():
    try:
        return int(pltpu.get_tpu_info().vmem_capacity_bytes)
    except Exception:
        return 64 * 1024 * 1024          # conservative: v7x physical VMEM


def _is_v7x():
    try:
        kind = jax.devices()[0].device_kind.lower().replace(" ", "")
    except Exception:
        return False
    return ("v7" in kind) or ("tpu7" in kind)


def _plan(M, sample_num, hidden):
    """Static planning of (tm, grid_m, vmem_limit_bytes).

    hidden=32 / sample_num=16 makes this an HBM-stream kernel, so we want as
    few grid steps as possible (1 on v5e/v6e's single TC, an even >=2 on v7x
    so both TCs get equal work), each moving >= ~1 MB, capped by a
    generation-aware VMEM budget that counts the f32 intermediates and the
    lane-padded input tile.
    """
    # Per-row resident VMEM (f32):
    #   x tile  : (tm, sample_num) lane-pads 16 -> 128 lanes, double-buffered
    #   out tile: (1, tm) int32 pads 1 -> 8 sublanes, double-buffered
    #   h1, h2  : (hidden, tm) f32
    #   pred / argmax temps / transposed x: ~4 * sample_num rows of f32
    per_row = (2 * 128 + 2 * 8 + 2 * hidden + 4 * sample_num) * 4
    cap = _vmem_capacity_bytes()
    budget = int(min(cap, 128 << 20) * 0.40)
    tm_cap = max(128, (min(32768, budget // per_row) // 128) * 128)
    target_steps = 2 if _is_v7x() else 1

    if M <= 128:
        tm, grid_m = M, 1                       # tiny problem: one full-extent block
    else:
        grid_m = max(target_steps, _cdiv(M, tm_cap))
        if target_steps == 2 and grid_m % 2:
            grid_m += 1                         # even grid -> both v7x TCs busy
        tm = _round_up(_cdiv(M, grid_m), 128)   # lane-dense int32 output rows
        if tm >= M:
            tm, grid_m = M, 1                   # single full-extent block, no ragged tail
        else:
            grid_m = _cdiv(M, tm)               # never schedule fully-empty tail tiles

    weight_bytes = (sample_num * hidden + hidden * hidden + hidden * sample_num
                    + 2 * hidden + sample_num) * 4
    resident = (2 * (tm * 128 * 4 + tm * 8 * 4)            # in/out tiles, double-buffered
                + (2 * hidden + 4 * sample_num) * tm * 4   # f32 intermediates
                + 2 * weight_bytes + (2 << 20))            # weights + slack
    vmem_limit = int(min(max(resident + resident // 2, 16 << 20), (cap // 10) * 9))
    return tm, grid_m, vmem_limit


def _gumbel_kernel(x_ref, w1_ref, b1_ref, w2_ref, b2_ref, w3_ref, b3_ref, out_ref):
    x = x_ref[...]                                     # (tm, sample_num) f32

    # embedding_layer: h1^T = W1 @ x^T + b1            -> (hidden, tm)
    # Contract x's last axis directly (A @ B^T form); Mosaic handles the
    # transposed operand in-kernel - no wrapper-side transpose / HBM copy.
    dnums = (((1,), (1,)), ((), ()))
    h1 = lax.dot_general(w1_ref[...], x, dnums,
                         preferred_element_type=jnp.float32) + b1_ref[...]

    # pred_layer[0:2]: h2 = relu(W2 @ h1 + b2)         -> (hidden, tm)
    h2 = jnp.dot(w2_ref[...], h1, preferred_element_type=jnp.float32) + b2_ref[...]
    h2 = jnp.maximum(h2, 0.0)

    # pred_layer[2]: pred = W3 @ h2 + b3               -> (sample_num, tm)
    pred = jnp.dot(w3_ref[...], h2, preferred_element_type=jnp.float32) + b3_ref[...]

    # Argmax over the class (sublane) axis, first-occurrence tie-break
    # (matches torch.argmax).  Result is a lane-dense (1, tm) int32 row.
    n_cls = pred.shape[0]
    cls = lax.broadcasted_iota(jnp.int32, pred.shape, 0)
    maxv = jnp.max(pred, axis=0, keepdims=True)
    masked = jnp.where(pred == maxv, cls, jnp.int32(n_cls))
    out_ref[0] = jnp.min(masked, axis=0, keepdims=True)


@functools.partial(jax.jit, static_argnames=("tm", "grid_m", "vmem_limit"))
def _gumbel_call(sample, w1, b1, w2, b2, w3, b3, *, tm, grid_m, vmem_limit):
    B, S, sample_num = sample.shape
    hidden = w1.shape[0]
    M = B * S

    # Natural row-major layout straight into the kernel; no transpose, no pad.
    x2d = sample.reshape(M, sample_num)
    b1c = b1.reshape(hidden, 1)
    b2c = b2.reshape(hidden, 1)
    b3c = b3.reshape(sample_num, 1)

    weight_bytes = (sample_num * hidden + hidden * hidden + hidden * sample_num
                    + 2 * hidden + sample_num) * 4
    flops = 2 * grid_m * tm * (sample_num * hidden + hidden * hidden
                               + hidden * sample_num)
    bytes_accessed = M * sample_num * 4 + weight_bytes + grid_m * tm * 4

    out = pl.pallas_call(
        _gumbel_kernel,
        out_shape=jax.ShapeDtypeStruct((grid_m, 1, tm), jnp.int32),
        grid_spec=pltpu.PrefetchScalarGridSpec(
            num_scalar_prefetch=0,
            grid=(grid_m,),
            in_specs=[
                pl.BlockSpec((tm, sample_num), lambda i: (i, 0)),      # activations
                pl.BlockSpec((hidden, sample_num), lambda i: (0, 0)),  # W_emb
                pl.BlockSpec((hidden, 1), lambda i: (0, 0)),           # b_emb
                pl.BlockSpec((hidden, hidden), lambda i: (0, 0)),      # W_pred0
                pl.BlockSpec((hidden, 1), lambda i: (0, 0)),           # b_pred0
                pl.BlockSpec((sample_num, hidden), lambda i: (0, 0)),  # W_pred2
                pl.BlockSpec((sample_num, 1), lambda i: (0, 0)),       # b_pred2
            ],
            out_specs=pl.BlockSpec((1, 1, tm), lambda i: (i, 0, 0)),   # lane-dense
        ),
        compiler_params=pltpu.CompilerParams(
            dimension_semantics=("parallel",),
            vmem_limit_bytes=vmem_limit),
        cost_estimate=pl.CostEstimate(
            flops=flops, transcendentals=0, bytes_accessed=bytes_accessed),
    )(x2d, w1, b1c, w2, b2c, w3, b3c)

    # Garbage rows from any ragged tail block sit at the end; slice them off.
    return out.reshape(-1)[:M].reshape(B, S)


def gumbel_forward(sample, params):
    """sample: (B, S, sample_num) float32 -> (B, S) int32 argmax indices."""
    w1, b1, w2, b2, w3, b3 = params                    # PyTorch layout: w (out,in), b (out,)
    B, S, sample_num = sample.shape
    hidden = w1.shape[0]
    tm, grid_m, vmem_limit = _plan(B * S, sample_num, hidden)
    return _gumbel_call(sample, w1, b1, w2, b2, w3, b3,
                        tm=tm, grid_m=grid_m, vmem_limit=vmem_limit)


def init_params(key, sample_num, hidden_size):
    """PyTorch nn.Linear-style init; weights stored (out, in), biases (out,)."""
    ks = jax.random.split(key, 6)

    def linear(kw, kb, fan_in, fan_out):
        bound = 1.0 / jnp.sqrt(fan_in)
        w = jax.random.uniform(kw, (fan_out, fan_in), jnp.float32, -bound, bound)
        b = jax.random.uniform(kb, (fan_out,), jnp.float32, -bound, bound)
        return w, b

    w1, b1 = linear(ks[0], ks[1], sample_num, hidden_size)   # embedding_layer
    w2, b2 = linear(ks[2], ks[3], hidden_size, hidden_size)  # pred_layer[0]
    w3, b3 = linear(ks[4], ks[5], hidden_size, sample_num)   # pred_layer[2]
    return (w1, b1, w2, b2, w3, b3)


def reference_forward(sample, params):
    """Pure-JAX f32 reference of the module's eval path (returns argmax and logits)."""
    w1, b1, w2, b2, w3, b3 = params
    h1 = jnp.dot(sample, w1.T) + b1
    h2 = jnp.maximum(jnp.dot(h1, w2.T) + b2, 0.0)
    pred = jnp.dot(h2, w3.T) + b3
    return jnp.argmax(pred, axis=-1).astype(jnp.int32), pred


if __name__ == "__main__":
    B, S = 2, 8          # batch, sequence
    sample_num = 16      # vocabulary / sample dimension
    hidden_size = 32

    key = jax.random.PRNGKey(0)
    k_param, k_x = jax.random.split(key)
    params = init_params(k_param, sample_num, hidden_size)
    sample = jax.random.normal(k_x, (B, S, sample_num), dtype=jnp.float32)

    out = jax.block_until_ready(gumbel_forward(sample, params))
    ref, pred_ref = reference_forward(sample, params)

    assert out.shape == (B, S), out.shape
    if not bool(jnp.array_equal(out, ref)):
        # Only acceptable divergence: near-exact ties in the f32 logits
        # (different f32 accumulation order between MXU and XLA dot).
        p = pred_ref.reshape(-1, sample_num)
        o = out.reshape(-1)[:, None]
        r = ref.reshape(-1)[:, None]
        gap = jnp.abs(jnp.take_along_axis(p, o, axis=1)
                      - jnp.take_along_axis(p, r, axis=1))
        assert bool(jnp.all(gap < 1e-4)), (out, ref)

    print("KERNEL_OK")
</pallas_src>

<mosaic_0001>
module attributes {stable_mosaic.version = 11 : i64} {
  func.func @_gumbel_kernel(%arg0: i32, %arg1: memref<16x16xf32, #tpu.memory_space<vmem>>, %arg2: memref<32x16xf32, #tpu.memory_space<vmem>>, %arg3: memref<32x1xf32, #tpu.memory_space<vmem>>, %arg4: memref<32x32xf32, #tpu.memory_space<vmem>>, %arg5: memref<32x1xf32, #tpu.memory_space<vmem>>, %arg6: memref<16x32xf32, #tpu.memory_space<vmem>>, %arg7: memref<16x1xf32, #tpu.memory_space<vmem>>, %arg8: memref<1x1x16xi32, #tpu.memory_space<vmem>>) attributes {dimension_semantics = [#tpu.dimension_semantics<parallel>], iteration_bounds = array<i64: 1>, scalar_prefetch = 0 : i64, scratch_operands = 0 : i64, tpu.core_type = #tpu.core_type<tc>, window_params = [{transform_indices = @transform_0, window_bounds = array<i64: 16, 16>}, {pipeline_mode = #tpu.pipeline_mode<synchronous>, transform_indices = @transform_1, window_bounds = array<i64: 32, 16>}, {pipeline_mode = #tpu.pipeline_mode<synchronous>, transform_indices = @transform_2, window_bounds = array<i64: 32, 1>}, {pipeline_mode = #tpu.pipeline_mode<synchronous>, transform_indices = @transform_3, window_bounds = array<i64: 32, 32>}, {pipeline_mode = #tpu.pipeline_mode<synchronous>, transform_indices = @transform_4, window_bounds = array<i64: 32, 1>}, {pipeline_mode = #tpu.pipeline_mode<synchronous>, transform_indices = @transform_5, window_bounds = array<i64: 16, 32>}, {pipeline_mode = #tpu.pipeline_mode<synchronous>, transform_indices = @transform_6, window_bounds = array<i64: 16, 1>}, {transform_indices = @transform_7, window_bounds = array<i64: 1, 1, 16>}]} {
    %c0 = arith.constant 0 : index
    %c0_0 = arith.constant 0 : index
    %0 = vector.load %arg1[%c0, %c0_0] : memref<16x16xf32, #tpu.memory_space<vmem>>, vector<16x16xf32>
    %c0_1 = arith.constant 0 : index
    %c0_2 = arith.constant 0 : index
    %1 = vector.load %arg2[%c0_1, %c0_2] : memref<32x16xf32, #tpu.memory_space<vmem>>, vector<32x16xf32>
    %cst = arith.constant dense<0.000000e+00> : vector<32x16xf32>
    %2 = tpu.matmul %1, %0, %cst {dimension_numbers = #tpu.dot_dimension_numbers<[1], [1], [0], [0], [0, 0, 1, 0], [], []>} : vector<32x16xf32>, vector<16x16xf32>, vector<32x16xf32> -> vector<32x16xf32>
    %c0_3 = arith.constant 0 : index
    %c0_4 = arith.constant 0 : index
    %3 = vector.load %arg3[%c0_3, %c0_4] : memref<32x1xf32, #tpu.memory_space<vmem>>, vector<32x1xf32>
    %4 = vector.broadcast %3 : vector<32x1xf32> to vector<32x16xf32>
    %5 = arith.addf %2, %4 : vector<32x16xf32>
    %c0_5 = arith.constant 0 : index
    %c0_6 = arith.constant 0 : index
    %6 = vector.load %arg4[%c0_5, %c0_6] : memref<32x32xf32, #tpu.memory_space<vmem>>, vector<32x32xf32>
    %cst_7 = arith.constant dense<0.000000e+00> : vector<32x16xf32>
    %7 = tpu.matmul %6, %5, %cst_7 {dimension_numbers = #tpu.dot_dimension_numbers<[1], [0], [0], [1], [0, 0, 1, 1], [], []>} : vector<32x32xf32>, vector<32x16xf32>, vector<32x16xf32> -> vector<32x16xf32>
    %c0_8 = arith.constant 0 : index
    %c0_9 = arith.constant 0 : index
    %8 = vector.load %arg5[%c0_8, %c0_9] : memref<32x1xf32, #tpu.memory_space<vmem>>, vector<32x1xf32>
    %9 = vector.broadcast %8 : vector<32x1xf32> to vector<32x16xf32>
    %10 = arith.addf %7, %9 : vector<32x16xf32>
    %cst_10 = arith.constant 0.000000e+00 : f32
    %11 = vector.broadcast %cst_10 : f32 to vector<32x16xf32>
    %12 = arith.maximumf %10, %11 : vector<32x16xf32>
    %c0_11 = arith.constant 0 : index
    %c0_12 = arith.constant 0 : index
    %13 = vector.load %arg6[%c0_11, %c0_12] : memref<16x32xf32, #tpu.memory_space<vmem>>, vector<16x32xf32>
    %cst_13 = arith.constant dense<0.000000e+00> : vector<16x16xf32>
    %14 = tpu.matmul %13, %12, %cst_13 {dimension_numbers = #tpu.dot_dimension_numbers<[1], [0], [0], [1], [0, 0, 1, 1], [], []>} : vector<16x32xf32>, vector<32x16xf32>, vector<16x16xf32> -> vector<16x16xf32>
    %c0_14 = arith.constant 0 : index
    %c0_15 = arith.constant 0 : index
    %15 = vector.load %arg7[%c0_14, %c0_15] : memref<16x1xf32, #tpu.memory_space<vmem>>, vector<16x1xf32>
    %16 = vector.broadcast %15 : vector<16x1xf32> to vector<16x16xf32>
    %17 = arith.addf %14, %16 : vector<16x16xf32>
    %18 = tpu.iota {dimensions = array<i32: 0>} : vector<16x16xi32>
    %cst_16 = arith.constant dense<0xFF800000> : vector<16xf32>
    %19 = vector.multi_reduction <maximumf>, %17, %cst_16 [0] : vector<16x16xf32> to vector<16xf32>
    %20 = vector.shape_cast %19 : vector<16xf32> to vector<1x16xf32>
    %21 = vector.broadcast %20 : vector<1x16xf32> to vector<16x16xf32>
    %22 = arith.cmpf oeq, %17, %21 : vector<16x16xf32>
    %c16_i32 = arith.constant 16 : i32
    %23 = vector.broadcast %c16_i32 : i32 to vector<16x16xi32>
    %24 = arith.select %22, %18, %23 : vector<16x16xi1>, vector<16x16xi32>
    %cst_17 = arith.constant dense<2147483647> : vector<16xi32>
    %25 = vector.multi_reduction <minsi>, %24, %cst_17 [0] : vector<16x16xi32> to vector<16xi32>
    %26 = vector.shape_cast %25 : vector<16xi32> to vector<1x16xi32>
    %c0_18 = arith.constant 0 : index
    %c0_19 = arith.constant 0 : index
    %c0_20 = arith.constant 0 : index
    %27 = vector.load %arg8[%c0_18, %c0_19, %c0_20] : memref<1x1x16xi32, #tpu.memory_space<vmem>>, vector<1x1x16xi32>
    %28 = vector.shape_cast %27 : vector<1x1x16xi32> to vector<1x16xi32>
    %29 = vector.shape_cast %26 : vector<1x16xi32> to vector<1x1x16xi32>
    tpu.vector_store %arg8[%c0_18, %c0_19, %c0_20], %29 {strides = array<i32>} : memref<1x1x16xi32, #tpu.memory_space<vmem>>, vector<1x1x16xi32>,
    return
  }
  func.func @transform_0(%arg0: i32) -> (i32, i32) {
    %c0_i32 = arith.constant 0 : i32
    %c0_i32_0 = arith.constant 0 : i32
    return %arg0, %c0_i32 : i32, i32
  }
  func.func @transform_1(%arg0: i32) -> (i32, i32) {
    %c0_i32 = arith.constant 0 : i32
    %c0_i32_0 = arith.constant 0 : i32
    %c0_i32_1 = arith.constant 0 : i32
    return %c0_i32, %c0_i32_0 : i32, i32
  }
  func.func @transform_2(%arg0: i32) -> (i32, i32) {
    %c0_i32 = arith.constant 0 : i32
    %c0_i32_0 = arith.constant 0 : i32
    %c0_i32_1 = arith.constant 0 : i32
    return %c0_i32, %c0_i32_0 : i32, i32
  }
  func.func @transform_3(%arg0: i32) -> (i32, i32) {
    %c0_i32 = arith.constant 0 : i32
    %c0_i32_0 = arith.constant 0 : i32
    %c0_i32_1 = arith.constant 0 : i32
    return %c0_i32, %c0_i32_0 : i32, i32
  }
  func.func @transform_4(%arg0: i32) -> (i32, i32) {
    %c0_i32 = arith.constant 0 : i32
    %c0_i32_0 = arith.constant 0 : i32
    %c0_i32_1 = arith.constant 0 : i32
    return %c0_i32, %c0_i32_0 : i32, i32
  }
  func.func @transform_5(%arg0: i32) -> (i32, i32) {
    %c0_i32 = arith.constant 0 : i32
    %c0_i32_0 = arith.constant 0 : i32
    %c0_i32_1 = arith.constant 0 : i32
    return %c0_i32, %c0_i32_0 : i32, i32
  }
  func.func @transform_6(%arg0: i32) -> (i32, i32) {
    %c0_i32 = arith.constant 0 : i32
    %c0_i32_0 = arith.constant 0 : i32
    %c0_i32_1 = arith.constant 0 : i32
    return %c0_i32, %c0_i32_0 : i32, i32
  }
  func.func @transform_7(%arg0: i32) -> (i32, i32, i32) {
    %c0_i32 = arith.constant 0 : i32
    %c0_i32_0 = arith.constant 0 : i32
    %c0_i32_1 = arith.constant 0 : i32
    return %arg0, %c0_i32, %c0_i32_0 : i32, i32, i32
  }
}

</mosaic_0001>

<bundles_post_ra>
// kernel: _gumbel_call.1
= control target key start
LH: loop header
LB: loop body
LE: loop exit
PB: predicated region body
PF: predicated region fallthrough
CT: control target
= control target key end

     0   :  { %vm56_vm0 = vcmask 130048   ;;  %v278_v1 = vmov 0   ;;  %vm132_vm1 = vcmask 261120   ;;  %v221_v61 = vlaneseq  ;;  %s406_s0 = inlined_call_operand.vmem [shape: f32[16,16], index: 0, kind: input, shape index: {}]   ;;  %s407_s2 = inlined_call_operand.vmem [shape: f32[32,1], index: 2, kind: input, shape index: {}]   ;;  %s408_s1 = inlined_call_operand.vmem [shape: f32[32,16], index: 1, kind: input, shape index: {}]   ;;  %s409_s4 = inlined_call_operand.vmem [shape: f32[32,1], index: 4, kind: input, shape index: {}]   ;;  %s410_s6 = inlined_call_operand.vmem [shape: f32[16,1], index: 6, kind: input, shape index: {}]   ;;  %s411_s3 = inlined_call_operand.vmem [shape: f32[32,32], index: 3, kind: input, shape index: {}]   ;;  %s412_s5 = inlined_call_operand.vmem [shape: f32[16,32], index: 5, kind: input, shape index: {}]   ;;  %s413_s7 = inlined_call_operand.vmem [shape: s32[1,1,16], index: 7, kind: output, shape index: {}]  }
   0x1   :  { %v27_v0 = vld [vmem:[%s406_s0 + $0x8] sm:$0xff]  ;;  %275 = vset.pattern.permute.xlu0 %v278_v1  ;;  %276 = vset.pattern.permute.xlu1 %v278_v1  ;;  %v35_v2 = vld [vmem:[%s407_s2 + $0x18] sm:$0xff]  ;;  %v26_v3 = vld [vmem:[%s406_s0] sm:$0xff]  ;;  %vm250_vm7 = vcmask 122880  }
   0x2   :  { %268 = vmatpush.xpose.msk.msra.mxu3 %vm56_vm0, %v27_v0  ;;  %256 = vmatpush.xpose.msk.msra.mxu0 %vm56_vm0, %v27_v0  ;;  %v33_v4 = vld [vmem:[%s407_s2 + $0x8] sm:$0xff]  ;;  %v28_v6 = vld [vmem:[%s408_s1] sm:$0xff]  ;;  %v34_v7 = vld [vmem:[%s407_s2 + $0x10] sm:$0xff]  ;;  %v222_v0 = vshrl.u32 %v221_v61, 7 }
   0x3   :  { %53 = vperm.xlu0 %275, %v35_v2   ;;  %277 = vset.pattern.permute.xlu2 %v278_v1  ;;  %v29_v5 = vld [vmem:[%s408_s1 + $0x8] sm:$0xff]  ;;  %v32_v8 = vld [vmem:[%s407_s2] sm:$0xff]  ;;  %v30_v9 = vld [vmem:[%s408_s1 + $0x10] sm:$0xff] }
   0x4   :  { %43 = vperm.xlu1 %276, %v33_v4   ;;  %v109_v10 = vld [vmem:[%s409_s4 + $0x8] sm:$0xff]  ;;  %v108_v11 = vld [vmem:[%s409_s4] sm:$0xff]  ;;  %v31_v12 = vld [vmem:[%s408_s1 + $0x18] sm:$0xff] }
   0x5   :  { %v181_v13 = vld [vmem:[%s410_s6 + $0x8] sm:$0xff]  ;;  %v111_v17 = vld [vmem:[%s409_s4 + $0x18] sm:$0xff]  ;;  %v110_v21 = vld [vmem:[%s409_s4 + $0x10] sm:$0xff] }
   0x6   :  { %269 = vmatpush.xpose.msk.msra.mxu3 %vm56_vm0, %v26_v3  ;;  %257 = vmatpush.xpose.msk.msra.mxu0 %vm56_vm0, %v26_v3  ;;  %v104_v28 = vld [vmem:[%s411_s3] sm:$0xff]  ;;  %v105_v29 = vld [vmem:[%s411_s3 + $0x8] sm:$0xff]  ;;  %v106_v31 = vld [vmem:[%s411_s3 + $0x10] sm:$0xff]  ;;  %v223_v3 = vadd.s32 8, %v222_v0 }
   0x7   :  { %129 = vperm.xlu2 %277, %v111_v17   ;;  %v180_v30 = vld [vmem:[%s410_s6] sm:$0xff]  ;;  %v107_v32 = vld [vmem:[%s411_s3 + $0x18] sm:$0xff]  ;;  %v179_v50 = vld [vmem:[%s412_s5 + $0x8] sm:$0xff] }
   0x8   :  { %v178_v49 = vld [vmem:[%s412_s5] sm:$0xff] }
   0x9   :  { %259 = vmatmul.msk.f32.vlgmr.msra.gmra.mxu3 %vm56_vm0, %v29_v5  ;;  %258 = vmatmul.msk.f32.vlgmr.msra.gmra.mxu0 %vm56_vm0, %v28_v6 }
   0xb   :  { %48 = vperm.xlu0 %275, %v34_v7  }
   0xc   :  { %38 = vperm.xlu1 %276, %v32_v8  }
   0xf   :  { %124 = vperm.xlu2 %277, %v110_v21  }
  0x11   :  { %260 = vmatmul.msk.f32.gmra.mxu3 %vm56_vm0, %v30_v9 }
  0x13   :  { %119 = vperm.xlu0 %275, %v109_v10  }
  0x14   :  { %114 = vperm.xlu1 %276, %v108_v11  }
  0x17   :  { %184 = vperm.xlu2 %277, %v180_v30  }
  0x19   :  { %261 = vmatmul.msk.f32.gmra.mxu3 %vm56_vm0, %v31_v12 }
  0x1b   :  { %189 = vperm.xlu0 %275, %v181_v13  }
  0x61   :  { %v130_v34 = vpop.permute.xlu2 %129 }
  0x69   :  { %v125_v36 = vpop.permute.xlu2 %124 }
  0x71   :  { %v185_v52 = vpop.permute.xlu2 %184 }
  0x75   :  { %v54_v15 = vpop.permute.xlu0 %53 }
  0x76   :  { %v44_v18 = vpop.permute.xlu1 %43 }
  0x7d   :  { %v49_v22 = vpop.permute.xlu0 %48 }
  0x7e   :  { %v39_v26 = vpop.permute.xlu1 %38 }
  0x85   :  { %v120_v40 = vpop.permute.xlu0 %119 }
  0x86   :  { %v92_v24 = vpop.f32.mrf.mxu0  ;;  %v115_v44 = vpop.permute.xlu1 %114 }
  0x87   :  { %v93_v27 = vadd.f32 %v92_v24, %v39_v26 }
  0x8c   :  { %v95_v14 = vpop.f32.mrf.mxu3 }
  0x8d   :  { %v96_v25 = vadd.f32 %v95_v14, %v44_v18  ;;  %v190_v54 = vpop.permute.xlu0 %189 }
  0x94   :  { %v98_v16 = vpop.f32.mrf.mxu3 }
  0x95   :  { %v99_v23 = vadd.f32 %v98_v16, %v49_v22 }
  0x9c   :  { %v101_v19 = vpop.f32.mrf.mxu3 }
  0x9d   :  { %v102_v20 = vadd.f32 %v101_v19, %v54_v15 }
  0x9f   :  { %157 = vmatpush.msrb.mxu0 %v102_v20  ;;  %270 = vmatpush.msra.mxu1 %v102_v20 }
  0xa1   :  { %158 = vmatpush.msrb.mxu0 %v99_v23  ;;  %271 = vmatpush.msra.mxu1 %v99_v23 }
  0xa3   :  { %159 = vmatpush.msrb.mxu0 %v96_v25  ;;  %272 = vmatpush.msra.mxu1 %v96_v25 }
  0xa5   :  { %160 = vmatpush.msrb.mxu0 %v93_v27  ;;  %273 = vmatpush.msra.mxu1 %v93_v27 }
  0xa6   :  { %262 = vmatmul.msk.f32.vlgmr.msrb.gmra.mxu0 %vm132_vm1, %v104_v28  ;;  %263 = vmatmul.msk.f32.vlgmr.msra.gmra.mxu1 %vm132_vm1, %v105_v29 }
  0xae   :  { %264 = vmatmul.msk.f32.gmra.mxu1 %vm132_vm1, %v106_v31 }
  0xb6   :  { %265 = vmatmul.msk.f32.gmra.mxu1 %vm132_vm1, %v107_v32 }
 0x123   :  { %v165_v33 = vpop.f32.mrf.mxu1  ;;  %v162_v41 = vpop.f32.mrf.mxu0 }
 0x124   :  { %v166_v42 = vadd.f32 %v165_v33, %v120_v40  ;;  %v163_v45 = vadd.f32 %v162_v41, %v115_v44 }
 0x126   :  { %v175_v47 = vmax.f32 %v166_v42, 0.0  ;;  %v174_v48 = vmax.f32 %v163_v45, 0.0 }
 0x12b   :  { %v168_v35 = vpop.f32.mrf.mxu1 }
 0x12c   :  { %v169_v38 = vadd.f32 %v168_v35, %v125_v36 }
 0x12e   :  { %v176_v46 = vmax.f32 %v169_v38, 0.0 }
 0x133   :  { %v171_v37 = vpop.f32.mrf.mxu1 }
 0x134   :  { %v172_v39 = vadd.f32 %v171_v37, %v130_v34 }
 0x136   :  { %v177_v43 = vmax.f32 %v172_v39, 0.0 }
 0x138   :  { %210 = vmatpush.msra.mxu2 %v177_v43 }
 0x13a   :  { %211 = vmatpush.msra.mxu2 %v176_v46 }
 0x13c   :  { %212 = vmatpush.msra.mxu2 %v175_v47 }
 0x13e   :  { %213 = vmatpush.msra.mxu2 %v174_v48 }
 0x13f   :  { %266 = vmatmul.msk.f32.vlgmr.msra.gmra.mxu2 %vm132_vm1, %v178_v49 }
 0x147   :  { %267 = vmatmul.msk.f32.gmra.mxu2 %vm132_vm1, %v179_v50 }
 0x1c2   :  { %v215_v51 = vpop.f32.mrf.mxu2 }
 0x1c3   :  { %v216_v53 = vadd.f32 %v215_v51, %v185_v52 }
 0x1c5   :  { %v224_v57 = vsel %vm56_vm0, %v216_v53, -inf }
 0x1ca   :  { %v218_v55 = vpop.f32.mrf.mxu2 }
 0x1cb   :  { %v219_v56 = vadd.f32 %v218_v55, %v190_v54 }
 0x1cd   :  { %v225_v58 = vsel %vm56_vm0, %v219_v56, -inf }
 0x1ce   :  { %v226_v59 = vmax.f32 %v224_v57, %v225_v58 }
 0x1d0   :  { %v227_v60 = vrot.slane %v226_v59, 4 }
 0x1d2   :  { %v228_v62 = vmax.f32 %v226_v59, %v227_v60 }
 0x1d4   :  { %v229_v63 = vrot.slane %v228_v62, 2 }
 0x1d6   :  { %v230_v1 = vmax.f32 %v228_v62, %v229_v63 }
 0x1d8   :  { %v231_v2 = vrot.slane %v230_v1, 1 }
 0x1da   :  { %v232_v4 = vmax.f32 %v230_v1, %v231_v2 }
 0x1dc   :  { %vm233_vm2 = vcmp.eq.f32.partialorder %v216_v53, %v232_v4  ;;  %vm234_vm3 = vcmp.eq.f32.partialorder %v219_v56, %v232_v4 }
 0x1dd   :  { %v235_v5 = vsel %vm233_vm2, %v222_v0, 16  ;;  %v236_v6 = vsel %vm234_vm3, %v223_v3, 16 }
 0x1de   :  { %v237_v7 = vsel %vm56_vm0, %v235_v5, 2147483647  ;;  %v238_v8 = vsel %vm56_vm0, %v236_v6, 2147483647 }
 0x1df   :  { %vm239_vm4 = vcmp.lt.s32.totalorder %v237_v7, %v238_v8 }
 0x1e0   :  { %v240_v9 = vsel %vm239_vm4, %v237_v7, %v238_v8 }
 0x1e1   :  { %v241_v10 = vrot.slane %v240_v9, 4 }
 0x1e3   :  { %vm242_vm5 = vcmp.lt.s32.totalorder %v240_v9, %v241_v10 }
 0x1e4   :  { %v243_v11 = vsel %vm242_vm5, %v240_v9, %v241_v10 }
 0x1e5   :  { %v244_v12 = vrot.slane %v243_v11, 2 }
 0x1e7   :  { %vm245_vm6 = vcmp.lt.s32.totalorder %v243_v11, %v244_v12 }
 0x1e8   :  { %v246_v13 = vsel %vm245_vm6, %v243_v11, %v244_v12 }
 0x1e9   :  { %v247_v14 = vrot.slane %v246_v13, 1 }
 0x1eb   :  { %vm248_vm8 = vcmp.lt.s32.totalorder %v246_v13, %v247_v14 }
 0x1ec   :  { %v249_v15 = vsel %vm248_vm8, %v246_v13, %v247_v14 }
 0x1ed   :  { %251 = vst.msk [vmem:[%s413_s7] sm:$0x1] %vm250_vm7, %v249_v15 }

</bundles_post_ra>
